<compile_context>
chip_gen: v7x
topology: tpu7x:2x2x1
jax: 0.10.0
libtpu: 0.0.40
codegen_flags: <defaults>
</compile_context>

<pallas_src>
import jax
import jax.numpy as jnp
from jax.experimental import pallas as pl
from jax.experimental.pallas import tpu as pltpu

EPS = 1e-9

_LANE = 128
_SUBLANE = 8


def _snakebeta_kernel(x_ref, p_ref, o_ref):
    # x_ref: (TC, TT); p_ref: (2, TC, 1) f32 = [alpha ; 1/(beta+eps)]; o_ref: (TC, TT)
    x = x_ref[...].astype(jnp.float32)
    a = p_ref[0]           # (TC, 1), broadcast over the lane axis
    inv_b = p_ref[1]       # (TC, 1), precomputed 1 / (beta + eps)
    s = jnp.sin(a * x)
    o_ref[...] = (x + inv_b * (s * s)).astype(o_ref.dtype)


def _choose_tiles(R, T, itemsize):
    """Byte-budgeted, (8,128)-legal tiles; never requires array-side padding."""
    total_bytes = R * T * itemsize
    # ~4 MiB blocks; shrink for mid-size tensors so the grid keeps >= ~8 steps
    # (feeds both v7x TensorCores); never below 1 MiB.
    target_bytes = min(4 << 20, max(total_bytes // 8, 1 << 20))

    # Lane (last) dim: full T, or the largest multiple of 128 within budget.
    max_tt = max(target_bytes // (_SUBLANE * itemsize), _LANE)
    if T <= max_tt:
        TT = T                                       # == full array dim -> legal
    else:
        TT = max((max_tt // _LANE) * _LANE, _LANE)   # % 128 == 0 -> legal

    # Sublane dim: full R, or a multiple of 8 within budget.
    max_tc = max(target_bytes // (TT * itemsize), _SUBLANE)
    if R <= max_tc:
        TC = R                                       # == full array dim -> legal
    else:
        TC = max((max_tc // _SUBLANE) * _SUBLANE, _SUBLANE)
    return TC, TT


def snakebeta(x, alpha, beta):
    """SnakeBeta forward: y = x + 1/(beta + eps) * sin(alpha * x)^2.

    x: (B, C, T); alpha, beta: (1, C, 1) raw parameters, exactly as the
    reference forward passes them into `snake` (alpha_logscale=False default
    -> ones). Returns (B, C, T), same dtype as x.
    # TODO(synk): the BigVGAN-style variant exp()s alpha/beta in forward()
    # when alpha_logscale=True; for that variant apply jnp.exp to both params
    # before calling this wrapper.
    """
    B, C, T = x.shape
    R = B * C
    itemsize = x.dtype.itemsize

    # Merge leading axes: free reshape, enables clean 2-D blocking.
    x2 = x.reshape(R, T)

    # Stack per-channel params into one tiny (2, R, 1) f32 array.
    # Row r of x2 is (batch b, channel c = r % C).
    alpha_f = alpha.astype(jnp.float32).reshape(1, C)
    inv_beta = 1.0 / (beta.astype(jnp.float32).reshape(1, C) + EPS)
    params = jnp.concatenate([alpha_f, inv_beta], axis=0)            # (2, C)
    if B > 1:
        params = jnp.tile(params, (1, B))                            # (2, B*C)
    params = params[:, :, None]                                      # (2, R, 1)

    TC, TT = _choose_tiles(R, T, itemsize)
    grid = (pl.cdiv(R, TC), pl.cdiv(T, TT))

    n_elems = R * T
    cost = pl.CostEstimate(
        flops=5 * n_elems,
        transcendentals=n_elems,
        bytes_accessed=2 * n_elems * itemsize + params.size * 4,
    )

    out2 = pl.pallas_call(
        _snakebeta_kernel,
        out_shape=jax.ShapeDtypeStruct((R, T), x.dtype),
        grid_spec=pltpu.PrefetchScalarGridSpec(
            num_scalar_prefetch=0,
            grid=grid,
            in_specs=[
                # streamed input tile
                pl.BlockSpec((TC, TT), lambda ri, ti: (ri, ti)),
                # stacked per-row params: tiny block, varies only with ri
                pl.BlockSpec((2, TC, 1), lambda ri, ti: (0, ri, 0)),
            ],
            out_specs=pl.BlockSpec((TC, TT), lambda ri, ti: (ri, ti)),
        ),
        compiler_params=pltpu.CompilerParams(
            dimension_semantics=("parallel", "parallel"),
            vmem_limit_bytes=48 << 20,
        ),
        cost_estimate=cost,
    )(x2, params)

    return out2.reshape(B, C, T)


def snakebeta_ref(x, alpha, beta):
    return x + (1.0 / (beta + EPS)) * jnp.sin(alpha * x) ** 2


if __name__ == "__main__":
    B, C, T = 2, 4, 16
    key = jax.random.PRNGKey(0)
    kx, ka, kb = jax.random.split(key, 3)
    x = jax.random.normal(kx, (B, C, T), dtype=jnp.float32)

    # SnakeBeta.__init__ with alpha_logscale=False (default) gives ones(1,C,1);
    # perturb slightly so the per-channel parameter path is actually exercised.
    alpha = 1.0 + 0.1 * jax.random.normal(ka, (1, C, 1), dtype=jnp.float32)
    beta = 1.0 + 0.1 * jax.random.normal(kb, (1, C, 1), dtype=jnp.float32)

    y = jax.block_until_ready(snakebeta(x, alpha, beta))
    y_ref = snakebeta_ref(x, alpha, beta)

    assert y.shape == x.shape and y.dtype == x.dtype
    assert jnp.allclose(y, y_ref, atol=1e-5, rtol=1e-5)

    print("KERNEL_OK")
</pallas_src>

<mosaic_0001>
module attributes {stable_mosaic.version = 11 : i64} {
  func.func @_snakebeta_kernel(%arg0: i32, %arg1: i32, %arg2: memref<8x16xf32, #tpu.memory_space<vmem>>, %arg3: memref<2x8x1xf32, #tpu.memory_space<vmem>>, %arg4: memref<8x16xf32, #tpu.memory_space<vmem>>) attributes {dimension_semantics = [#tpu.dimension_semantics<parallel>, #tpu.dimension_semantics<parallel>], iteration_bounds = array<i64: 1, 1>, scalar_prefetch = 0 : i64, scratch_operands = 0 : i64, tpu.core_type = #tpu.core_type<tc>, window_params = [{transform_indices = @transform_0, window_bounds = array<i64: 8, 16>}, {transform_indices = @transform_1, window_bounds = array<i64: 2, 8, 1>}, {transform_indices = @transform_2, window_bounds = array<i64: 8, 16>}]} {
    %c0 = arith.constant 0 : index
    %c0_0 = arith.constant 0 : index
    %0 = vector.load %arg2[%c0, %c0_0] : memref<8x16xf32, #tpu.memory_space<vmem>>, vector<8x16xf32>
    %c0_1 = arith.constant 0 : index
    %c0_2 = arith.constant 0 : index
    %c0_3 = arith.constant 0 : index
    %1 = vector.load %arg3[%c0_1, %c0_2, %c0_3] : memref<2x8x1xf32, #tpu.memory_space<vmem>>, vector<1x8x1xf32>
    %2 = vector.shape_cast %1 : vector<1x8x1xf32> to vector<8x1xf32>
    %c1 = arith.constant 1 : index
    %c0_4 = arith.constant 0 : index
    %c0_5 = arith.constant 0 : index
    %3 = vector.load %arg3[%c1, %c0_4, %c0_5] : memref<2x8x1xf32, #tpu.memory_space<vmem>>, vector<1x8x1xf32>
    %4 = vector.shape_cast %3 : vector<1x8x1xf32> to vector<8x1xf32>
    %5 = vector.broadcast %2 : vector<8x1xf32> to vector<8x16xf32>
    %6 = arith.mulf %5, %0 : vector<8x16xf32>
    %7 = math.sin %6 : vector<8x16xf32>
    %8 = arith.mulf %7, %7 : vector<8x16xf32>
    %9 = vector.broadcast %4 : vector<8x1xf32> to vector<8x16xf32>
    %10 = arith.mulf %9, %8 : vector<8x16xf32>
    %11 = arith.addf %0, %10 : vector<8x16xf32>
    %c0_6 = arith.constant 0 : index
    %c0_7 = arith.constant 0 : index
    %12 = vector.load %arg4[%c0_6, %c0_7] : memref<8x16xf32, #tpu.memory_space<vmem>>, vector<8x16xf32>
    tpu.vector_store %arg4[%c0_6, %c0_7], %11 {strides = array<i32>} : memref<8x16xf32, #tpu.memory_space<vmem>>, vector<8x16xf32>,
    return
  }
  func.func @transform_0(%arg0: i32, %arg1: i32) -> (i32, i32) {
    %c0_i32 = arith.constant 0 : i32
    return %arg0, %arg1 : i32, i32
  }
  func.func @transform_1(%arg0: i32, %arg1: i32) -> (i32, i32, i32) {
    %c0_i32 = arith.constant 0 : i32
    %c0_i32_0 = arith.constant 0 : i32
    %c0_i32_1 = arith.constant 0 : i32
    return %c0_i32, %arg0, %c0_i32_0 : i32, i32, i32
  }
  func.func @transform_2(%arg0: i32, %arg1: i32) -> (i32, i32) {
    %c0_i32 = arith.constant 0 : i32
    return %arg0, %arg1 : i32, i32
  }
}

</mosaic_0001>

<bundles_post_ra>
// kernel: tpu_custom_call.1
= control target key start
LH: loop header
LB: loop body
LE: loop exit
PB: predicated region body
PF: predicated region fallthrough
CT: control target
= control target key end

     0   :  { %v196_v1 = vmov 0   ;;  %s265_s0 = inlined_call_operand.vmem [shape: f32[8,16], index: 0, kind: input, shape index: {}]   ;;  %s266_s1 = inlined_call_operand.vmem [shape: f32[2,8,1], index: 1, kind: input, shape index: {}]   ;;  %s267_s2 = inlined_call_operand.hbm [shape: f32[8,16], index: 2, kind: output, shape index: {}]  }
   0x1   :  { %v13_v0 = vld [vmem:[%s266_s1] sm:$0xff]  ;;  %167 = vset.pattern.permute.xlu0 %v196_v1  ;;  %v150_v2 = vld [vmem:[%s266_s1 + $0x8] sm:$0xff] }
   0x2   :  { %18 = vperm.xlu0 %167, %v13_v0  }
   0x3   :  { %7 = vsyncpa [#allocation3], 0  ;;  %v228_v3 = vld [vmem:[%s265_s0] sm:$0xff]  ;;  %v197_v16 = vmov 683565275   ;;  %s203_s0 = smov [#allocation2]  }
   0x4   :  { %v198_v18 = vmov 2475754826   ;;  %v199_v21 = vmov 2131351028   ;;  %v200_v24 = vmov 2102212464  }
   0x5   :  { %v201_v27 = vmov 920167782   ;;  %v202_v30 = vmov 1326507024   ;;  %s142_s1 = sshll.u32 %s203_s0, 4  ;;  %vm134_vm13 = vcmask 130048   ;;  %s143_s1 = int_to_ptr.vmem [resolvable:$true] %s142_s1 }
   0x6   :  { %129 = vperm.xlu0 %167, %v150_v2   ;;  %s172_s15 = scalar_lea.vmem %s143_s1, 128  ;;  %p177_p1 = scmp.lt.s32.totalorder %s143_s1, %s143_s1 }
   0x7   :  { %p173_p0 = scmp.ne.s32.totalorder %s143_s1, %s172_s15  ;;  %p178_p2 = scmp.lt.s32.totalorder %s172_s15, %s172_s15 }
   0x9   :  { %p179_p3 = por %p178_p2, %p177_p1 }
   0xb   :  { %p180_p4 = pnand %p179_p3, %p173_p0 }
  0x81   :  { %v19_v4 = vpop.permute.xlu0 %18 }
  0x82   :  { %v231_v5 = vmul.f32 %v19_v4, %v228_v3 }
  0x84   :  { %v25_v6 = vand.u32 2139095040, %v231_v5  ;;  %v22_v10 = vand.u32 2147483647, %v231_v5  ;;  %vm24_vm7 = vcmp.lt.s32.totalorder %v231_v5, 0  ;;  %vm114_vm12 = vweird.f32 %v231_v5 }
  0x86   :  { %v26_v7 = vshrl.u32 %v25_v6, 23  ;;  %v29_v13 = vand.u32 8388607, %v22_v10  ;;  %vm23_vm8 = vcmp.le.f32.partialorder %v22_v10, 0.7853982 }
  0x88   :  { %v151_v8 = vadd.s32 4294967169, %v26_v7  ;;  %v30_v32 = vor.u32 8388608, %v29_v13 }
  0x8a   :  { %v32_v9 = vadd.s32 1, %v151_v8  ;;  %v70_v46 = vshll.u32 %v30_v32, 8 }
  0x8c   :  { %vm33_vm0 = vcmp.gt.s32.totalorder %v32_v9, 0 }
  0x8d   :  { %v34_v11 = vsel %vm33_vm0, %v32_v9, 0 }
  0x8e   :  { %v36_v12 = vand.u32 31, %v34_v11  ;;  %v35_v15 = vshrl.u32 %v34_v11, 5 }
  0x90   :  { %v37_v14 = vsub.s32 32, %v36_v12  ;;  %v39_v17 = vshll.u32 %v197_v16, %v36_v12  ;;  %v42_v19 = vshll.u32 %v198_v18, %v36_v12  ;;  %v45_v23 = vshll.u32 %v199_v21, %v36_v12 }
  0x91   :  { %v48_v26 = vshll.u32 %v200_v24, %v36_v12  ;;  %v51_v29 = vshll.u32 %v201_v27, %v36_v12  ;;  %vm54_vm1 = vcmp.lt.s32.totalorder %v35_v15, 1  ;;  %vm57_vm2 = vcmp.lt.s32.totalorder %v35_v15, 4 }
  0x92   :  { %v40_v20 = vshrl.u32 %v198_v18, %v37_v14  ;;  %v43_v22 = vshrl.u32 %v199_v21, %v37_v14  ;;  %v46_v25 = vshrl.u32 %v200_v24, %v37_v14  ;;  %v49_v28 = vshrl.u32 %v201_v27, %v37_v14 }
  0x93   :  { %v52_v31 = vshrl.u32 %v202_v30, %v37_v14  ;;  %v38_v41 = vshrl.u32 %v197_v16, %v37_v14  ;;  %vm56_vm3 = vcmp.lt.s32.totalorder %v35_v15, 3  ;;  %vm55_vm4 = vcmp.lt.s32.totalorder %v35_v15, 2 }
  0x94   :  { %v41_v33 = vor.u32 %v40_v20, %v39_v17  ;;  %v44_v34 = vor.u32 %v43_v22, %v42_v19  ;;  %v47_v35 = vor.u32 %v46_v25, %v45_v23  ;;  %v50_v36 = vor.u32 %v49_v28, %v48_v26 }
  0x95   :  { %v53_v37 = vor.u32 %v52_v31, %v51_v29 }
  0x96   :  { %v59_v38 = vsel %vm57_vm2, %v47_v35, 2102212464  ;;  %v62_v39 = vsel %vm54_vm1, %v41_v33, %v44_v34  ;;  %v66_v40 = vsel %vm54_vm1, %v44_v34, %v47_v35  ;;  %v63_v42 = vsel %vm57_vm2, %v50_v36, 920167782 }
  0x97   :  { %v67_v43 = vsel %vm57_vm2, %v53_v37, 1326507024  ;;  %v64_v44 = vsel %vm56_vm3, %v47_v35, %v63_v42  ;;  %v58_v47 = vsel %vm54_vm1, %v38_v41, %v41_v33  ;;  %v60_v48 = vsel %vm56_vm3, %v44_v34, %v59_v38 }
  0x98   :  { %v68_v45 = vsel %vm56_vm3, %v50_v36, %v67_v43  ;;  %v65_v49 = vsel %vm55_vm4, %v62_v39, %v64_v44  ;;  %v61_v55 = vsel %vm55_vm4, %v58_v47, %v60_v48  ;;  %v130_v36 = vpop.permute.xlu0 %129 }
  0x99   :  { %v69_v50 = vsel %vm55_vm4, %v66_v40, %v68_v45  ;;  %v240_v53 = vmul.u32.u64.low %v70_v46, %v65_v49  ;;  %v241_v54 = vmul.u32.u64.high %v70_v46, %v65_v49, %v240_v53  ;;  %v77_v57 = vmul.u32 %v70_v46, %v61_v55 }
  0x9a   :  { %v237_v51 = vmul.u32.u64.low %v70_v46, %v69_v50  ;;  %v238_v52 = vmul.u32.u64.high %v70_v46, %v69_v50, %v237_v51 }
  0x9b   :  { %v80_v56 = vadd.s32 1, %v241_v54 }
  0x9c   :  { %vm79_vm5 = vc.u32 %v238_v52, %v240_v53  ;;  %v78_v7 = vadd.s32 %v240_v53, %v238_v52 }
  0x9d   :  { %v81_v58 = vsel %vm79_vm5, %v80_v56, %v241_v54 }
  0x9e   :  { %v82_v59 = vadd.s32 %v81_v58, %v77_v57 }
  0xa0   :  { %v83_v60 = vadd.s32 536870912, %v82_v59 }
  0xa2   :  { %v84_v61 = vshrl.u32 %v83_v60, 30 }
  0xa4   :  { %v85_v62 = vshll.u32 %v84_v61, 30  ;;  %v108_v20 = vsub.s32 4, %v84_v61 }
  0xa6   :  { %v86_v63 = vsub.s32 %v82_v59, %v85_v62  ;;  %v109_v23 = vsel %vm24_vm7, %v108_v20, %v84_v61 }
  0xa7   :  { %v111_v25 = vsel %vm23_vm8, 0, %v109_v23 }
  0xa8   :  { %v88_v0 = vsub.s32 0, %v86_v63  ;;  %v115_v26 = vadd.s32 3, %v111_v25 }
  0xaa   :  { %v152_v1 = vmin.u32 %v88_v0, %v86_v63  ;;  %v116_v27 = vand.u32 3, %v115_v26 }
  0xac   :  { %v90_v2 = vclz %v152_v1  ;;  %vm121_vm9 = vcmp.eq.s32.totalorder %v116_v27, 2  ;;  %vm118_vm10 = vcmp.eq.s32.totalorder %v116_v27, 0  ;;  %vm117_vm11 = vcmp.lt.s32.totalorder %v116_v27, 2 }
  0xae   :  { %v153_v4 = vadd.s32 4294967294, %v90_v2 }
  0xb0   :  { %vm154_vm6 = vcmp.lt.s32.totalorder %v153_v4, 0 }
  0xb1   :  { %v93_v6 = vsel %vm154_vm6, 0, %v153_v4 }
  0xb2   :  { %v94_v8 = vsub.s32 32, %v93_v6  ;;  %v98_v9 = vsub.s32 4294967266, %v93_v6  ;;  %v95_v11 = vshll.u32 %v86_v63, %v93_v6 }
  0xb4   :  { %v96_v12 = vshrl.u32 %v78_v7, %v94_v8  ;;  %v99_v13 = vadd.s32 127, %v98_v9 }
  0xb6   :  { %v97_v14 = vor.u32 %v96_v12, %v95_v11  ;;  %v100_v15 = vshll.u32 %v99_v13, 23 }
  0xb8   :  { %v101_v16 = vor.u32 4788187, %v100_v15  ;;  %v104_v18 = vcvt.s32.f32 %v97_v14 }
  0xba   :  { %v102_v17 = vand.u32 2147483647, %v101_v16 }
  0xbc   :  { %v105_v19 = vmul.f32 %v104_v18, %v102_v17 }
  0xbe   :  { %v106_v21 = vxor.u32 2147483648, %v105_v19 }
  0xc0   :  { %v107_v22 = vsel %vm24_vm7, %v106_v21, %v105_v19 }
  0xc1   :  { %v110_v24 = vsel %vm23_vm8, %v231_v5, %v107_v22 }
  0xc2   :  { %168 = vcosq.f32 %v110_v24 }
  0xc3   :  { %170 = vsinq.f32 %v110_v24 }
  0xcc   :  { %v169_v28 = vpop.eup %168 }
  0xcd   :  { %v171_v29 = vpop.eup %170  ;;  %v122_v30 = vxor.u32 2147483648, %v169_v28 }
  0xce   :  { %v119_v31 = vxor.u32 2147483648, %v171_v29 }
  0xcf   :  { %v123_v32 = vsel %vm121_vm9, %v122_v30, %v171_v29 }
  0xd0   :  { %v120_v33 = vsel %vm118_vm10, %v169_v28, %v119_v31 }
  0xd1   :  { %v124_v10 = vsel %vm117_vm11, %v120_v33, %v123_v32 }
  0xd2   :  { %v125_v34 = vsel %vm114_vm12, nan, %v124_v10 }
  0xd3   :  { %v126_v35 = vmul.f32 %v125_v34, %v125_v34 }
  0xd5   :  { %v132_v37 = vmul.f32 %v130_v36, %v126_v35 }
  0xd7   :  { %v133_v38 = vadd.f32 %v132_v37, %v228_v3 }
  0xd9   :  { %135 = vst.msk [vmem:[#allocation2] sm:$0xff] %vm134_vm13, %v133_v38 }
  0xda   :  { %183 = shalt.err (!%p180_p4)
}
  0xdb   :  { %s184_s18 = scalar_lea.hbm %s267_s2, 128 }
  0xdc   :  { %p185_p5 = scmp.ne.s32.totalorder %s267_s2, %s184_s18  ;;  %p188_p6 = scmp.lt.u32.totalorder %s184_s18, %s267_s2 }
  0xde   :  { %p190_p7 = pnand %p188_p6, %p185_p5 }
  0xe0   :  { %193 = shalt.err (!%p190_p7)
}
  0xe1   :  { %145 = dma.vmem_to_hbm [thread:$0]  %s143_s1, 128, %s267_s2, [#allocation3]  }
  0xe2   :  { %194 = dma.done.wait [#allocation3], 128  }
  0xe3   :  { %195 = vsyncadd [#allocation3], 4294967168 }
  0xe4   :  { %149 = vsyncpa [#allocation3], 1 }

</bundles_post_ra>
